<compile_context>
chip_gen: v6e
topology: v6e:2x2x1
jax: 0.10.0
libtpu: 0.0.40
codegen_flags: <defaults>
</compile_context>

<pallas_src>
import functools

import jax
import jax.numpy as jnp
from jax.experimental import pallas as pl
from jax.experimental.pallas import tpu as pltpu

_NCORES = 2  # leading parallel grid axis: v7x has 2 TensorCores; harmless on v5e/v6e


def _round_up(a: int, b: int) -> int:
    return (a + b - 1) // b * b


# --------------------------------------------------------------------------
# Kernel 1: linear + BatchNorm batch-statistics (sublane-aligned partials).
# --------------------------------------------------------------------------
def _linear_stats_kernel(x_ref, w_ref, stats_ref):
    i = pl.program_id(1)                                     # N-tile index (arbitrary axis)
    y = jnp.dot(x_ref[...], w_ref[...],
                preferred_element_type=jnp.float32)          # [tile_n, P]

    # Partial sums over groups of 8 rows: reshape keeps the (8,128) tiling, the
    # axis-0 reduce is plain VPU adds (no XLU cross-sublane reduce).
    p = y.shape[1]
    part_sum = jnp.sum(y.reshape(-1, 8, p), axis=0)          # [8, P]
    part_sq = jnp.sum((y * y).reshape(-1, 8, p), axis=0)     # [8, P]

    @pl.when(i == 0)
    def _():
        stats_ref[...] = jnp.zeros_like(stats_ref)

    # Padded (zero) rows contribute 0; the wrapper divides by the real N.
    stats_ref[0:8, :] += part_sum
    stats_ref[8:16, :] += part_sq


# --------------------------------------------------------------------------
# Kernel 2: BN (folded scale/shift) + ReLU, yn writeback, segment-sum scatter.
# --------------------------------------------------------------------------
def _bn_scatter_kernel(x_ref, idx_ref, w_ref, scale_ref, shift_ref,
                       acc_ref, yn_ref, *, scatter_dtype):
    i = pl.program_id(1)
    y = jnp.dot(x_ref[...], w_ref[...],
                preferred_element_type=jnp.float32)          # [tile_n, P]
    # shift[P-1] = 1.0 (set in the wrapper) -> column P-1 is the count column.
    yn = jnp.maximum(y * scale_ref[...] + shift_ref[...], 0.0)

    # Lane-dense full-width store of the activations (first half of the final
    # output; columns [C, 2C) are 0 here and get the gather added in call 3).
    yn_ref[...] = yn

    m_pad, tile_n = acc_ref.shape[0], yn.shape[0]
    seg_ids = jax.lax.broadcasted_iota(jnp.int32, (m_pad, tile_n), 0)
    # One-hot built directly in [M, N] layout -> no transpose.  Padded rows
    # carry the sentinel index m_pad and match no segment.
    one_hot = (idx_ref[...] == seg_ids).astype(scatter_dtype)     # [Mp, tile_n]
    contrib = jnp.dot(one_hot, yn.astype(scatter_dtype),
                      preferred_element_type=jnp.float32)         # [Mp, P]

    @pl.when(i == 0)
    def _():
        acc_ref[...] = jnp.zeros_like(acc_ref)
    acc_ref[...] += contrib


# --------------------------------------------------------------------------
# Kernel 3: gather-back of seg_mean + add to yn, single full-width store.
# --------------------------------------------------------------------------
def _gather_concat_kernel(idx_ref, yn_ref, seg_ref, out_ref):
    m_pad = seg_ref.shape[0]
    tile_n = yn_ref.shape[0]
    seg_ids = jax.lax.broadcasted_iota(jnp.int32, (m_pad, tile_n), 0)
    one_hot = (idx_ref[...] == seg_ids).astype(seg_ref.dtype)     # [Mp, tile_n] bf16
    # gathered[n, :] = seg_mean[idx[n], :]  via a lhs-contracted MXU matmul.
    gathered = jax.lax.dot_general(
        one_hot, seg_ref[...],
        dimension_numbers=(((0,), (0,)), ((), ())),
        preferred_element_type=jnp.float32)                       # [tile_n, P]
    # yn has the real activations in cols [0,C) and zeros in [C,2C); seg table
    # is nonzero only in cols [C,2C); one add composes the concatenated output.
    out_ref[...] = yn_ref[...] + gathered


# --------------------------------------------------------------------------
# Wrapper
# --------------------------------------------------------------------------
def pfn_layer_v2(inputs, unq_inv, w, gamma, beta, *, num_segments, eps=1e-3,
                 tile_n=512, scatter_dtype=jnp.bfloat16):
    """inputs: [N, Cin] f32, unq_inv: [N] int, w: [Cin, C] f32 (= linear.weight.T)."""
    assert tile_n % 128 == 0, "tile_n must be a multiple of 128 (lane alignment)"
    n, cin = inputs.shape
    c = w.shape[1]

    # Single padded channel width P: real activations [0,C), gathered means
    # [C,2C), count column at P-1 (>= 2C by construction, sliced off at the end).
    p = _round_up(2 * c + 1, 128)
    cin_pad = _round_up(max(cin, 8), 8)
    m_pad = _round_up(max(num_segments, 16), 16)
    n_pad = _round_up(n, _NCORES * tile_n)
    num_tiles = n_pad // tile_n
    tpc = num_tiles // _NCORES                     # tiles per core

    # 48 MiB scoped VMEM: safe on v5e/v6e (128 MiB) and v7x (64 MiB / TC).
    # Raise toward 64-96 MiB on v5e/v6e when using tile_n >= 1024.
    vmem_limit = 48 * 1024 * 1024

    # ---- pad / lay out inputs -------------------------------------------------
    x_p = jnp.zeros((n_pad, cin_pad), jnp.float32).at[:n, :cin].set(
        inputs.astype(jnp.float32))
    w_p = jnp.zeros((cin_pad, p), jnp.float32).at[:cin, :c].set(
        w.astype(jnp.float32))
    # Padded point rows get sentinel segment id == m_pad (matches nothing).
    idx_row = jnp.full((1, n_pad), m_pad, jnp.int32).at[0, :n].set(
        unq_inv.astype(jnp.int32))
    gamma_p = jnp.zeros((p,), jnp.float32).at[:c].set(gamma.astype(jnp.float32))
    beta_p = jnp.zeros((p,), jnp.float32).at[:c].set(beta.astype(jnp.float32))

    # ---- call 1: linear + BN batch statistics (per-core partials) -------------
    stats2 = pl.pallas_call(
        _linear_stats_kernel,
        out_shape=jax.ShapeDtypeStruct((_NCORES, 16, p), jnp.float32),
        grid=(_NCORES, tpc),
        in_specs=[pl.BlockSpec((tile_n, cin_pad), lambda cc, i: (cc * tpc + i, 0)),
                  pl.BlockSpec((cin_pad, p), lambda cc, i: (0, 0))],
        out_specs=pl.BlockSpec((None, 16, p), lambda cc, i: (cc, 0, 0)),
        compiler_params=pltpu.CompilerParams(
            dimension_semantics=("parallel", "arbitrary"),
            vmem_limit_bytes=vmem_limit),
    )(x_p, w_p)

    # ---- fold BN into scale/shift (tiny [P]-sized glue in the wrapper) --------
    stats = jnp.sum(stats2, axis=0)                          # [16, P]
    sum_y = jnp.sum(stats[0:8], axis=0)                      # [P]
    sum_y2 = jnp.sum(stats[8:16], axis=0)                    # [P]
    inv_n = jnp.float32(1.0 / n)
    mean = sum_y * inv_n
    var = jnp.maximum(sum_y2 * inv_n - mean * mean, 0.0)     # biased batch var
    inv_std = jax.lax.rsqrt(var + jnp.float32(eps))
    scale = gamma_p * inv_std                                # 0 on padded channels
    shift = beta_p - mean * scale
    shift = shift.at[p - 1].set(1.0)                         # count column: relu(0*y+1)=1
    scale = scale.reshape(1, p)
    shift = shift.reshape(1, p)

    # ---- call 2: BN + ReLU, yn writeback, segment-sum (+counts) scatter -------
    seg_acc2, yn_out = pl.pallas_call(
        functools.partial(_bn_scatter_kernel, scatter_dtype=scatter_dtype),
        out_shape=(jax.ShapeDtypeStruct((_NCORES, m_pad, p), jnp.float32),
                   jax.ShapeDtypeStruct((n_pad, p), jnp.float32)),
        grid=(_NCORES, tpc),
        in_specs=[pl.BlockSpec((tile_n, cin_pad), lambda cc, i: (cc * tpc + i, 0)),
                  pl.BlockSpec((1, tile_n), lambda cc, i: (0, cc * tpc + i)),
                  pl.BlockSpec((cin_pad, p), lambda cc, i: (0, 0)),
                  pl.BlockSpec((1, p), lambda cc, i: (0, 0)),
                  pl.BlockSpec((1, p), lambda cc, i: (0, 0))],
        out_specs=(pl.BlockSpec((None, m_pad, p), lambda cc, i: (cc, 0, 0)),
                   pl.BlockSpec((tile_n, p), lambda cc, i: (cc * tpc + i, 0))),
        compiler_params=pltpu.CompilerParams(
            dimension_semantics=("parallel", "arbitrary"),
            vmem_limit_bytes=vmem_limit),
    )(x_p, idx_row, w_p, scale, shift)

    # ---- finalize segment means once, exactly, on a tiny array ----------------
    seg_acc = jnp.sum(seg_acc2, axis=0)                      # [Mp, P]
    counts = jnp.maximum(seg_acc[:, p - 1:p], 1.0)           # count[count<1] = 1
    seg_mean = seg_acc / counts                              # exact division
    # Place means into columns [C, 2C) of the gather table (bf16 for the MXU).
    seg_sh = jnp.zeros((m_pad, p), jnp.float32).at[:, c:2 * c].set(
        seg_mean[:, :c]).astype(jnp.bfloat16)

    # ---- call 3: gather-only + lane-dense concat store ------------------------
    out_p = pl.pallas_call(
        _gather_concat_kernel,
        out_shape=jax.ShapeDtypeStruct((n_pad, p), jnp.float32),
        grid=(num_tiles,),
        in_specs=[pl.BlockSpec((1, tile_n), lambda i: (0, i)),
                  pl.BlockSpec((tile_n, p), lambda i: (i, 0)),
                  pl.BlockSpec((m_pad, p), lambda i: (0, 0))],
        out_specs=pl.BlockSpec((tile_n, p), lambda i: (i, 0)),
        compiler_params=pltpu.CompilerParams(
            dimension_semantics=("parallel",),
            vmem_limit_bytes=vmem_limit),
    )(idx_row, yn_out, seg_sh)

    return out_p[:n, :2 * c]


# --------------------------------------------------------------------------
# Plain-JAX reference mirroring the PyTorch forward.
# --------------------------------------------------------------------------
def pfn_layer_v2_ref(inputs, unq_inv, w, gamma, beta, *, num_segments, eps=1e-3):
    y = inputs @ w
    mean = y.mean(axis=0)
    var = ((y - mean) ** 2).mean(axis=0)            # biased var (BN normalization)
    y = (y - mean) / jnp.sqrt(var + eps) * gamma + beta
    y = jnp.maximum(y, 0.0)
    seg_sum = jax.ops.segment_sum(y, unq_inv, num_segments=num_segments)
    counts = jax.ops.segment_sum(jnp.ones((y.shape[0],), jnp.float32), unq_inv,
                                 num_segments=num_segments)
    counts = jnp.maximum(counts, 1.0)
    seg_mean = seg_sum / counts[:, None]
    return jnp.concatenate([y, seg_mean[unq_inv, :]], axis=1)


if __name__ == "__main__":
    # PFNLayerV2(in_channels=10, out_channels=32, use_norm=True, last_layer=False)
    #   -> internal out_channels // 2 = 16, output feature dim = 32.
    N, CIN, OUT_CHANNELS, M = 200, 10, 32, 13
    C = OUT_CHANNELS // 2

    key = jax.random.PRNGKey(0)
    k_x, k_idx, k_w = jax.random.split(key, 3)

    inputs = jax.random.normal(k_x, (N, CIN), dtype=jnp.float32)
    unq_inv = jax.random.randint(k_idx, (N,), 0, M, dtype=jnp.int32)

    bound = 1.0 / jnp.sqrt(jnp.float32(CIN))
    w = jax.random.uniform(k_w, (CIN, C), jnp.float32, minval=-bound, maxval=bound)
    gamma = jnp.ones((C,), jnp.float32)   # BatchNorm1d default weight
    beta = jnp.zeros((C,), jnp.float32)   # BatchNorm1d default bias

    out = pfn_layer_v2(inputs, unq_inv, w, gamma, beta, num_segments=M)
    out = jax.block_until_ready(out)
    ref = pfn_layer_v2_ref(inputs, unq_inv, w, gamma, beta, num_segments=M)

    assert out.shape == (N, OUT_CHANNELS), out.shape
    # First half (linear + BN + ReLU) is f32 end-to-end -> tight tolerance.
    assert jnp.allclose(out[:, :C], ref[:, :C], rtol=1e-4, atol=1e-4), (
        float(jnp.max(jnp.abs(out[:, :C] - ref[:, :C]))))
    # Second half goes through a bf16 MXU scatter + bf16 gather -> bf16-level tol.
    assert jnp.allclose(out[:, C:], ref[:, C:], rtol=2e-2, atol=2e-2), (
        float(jnp.max(jnp.abs(out[:, C:] - ref[:, C:]))))

    print("KERNEL_OK")
</pallas_src>

<mosaic_0001>
module attributes {stable_mosaic.version = 11 : i64} {
  func.func @_linear_stats_kernel(%arg0: i32, %arg1: i32, %arg2: memref<512x16xf32, #tpu.memory_space<vmem>>, %arg3: memref<16x128xf32, #tpu.memory_space<vmem>>, %arg4: memref<1x16x128xf32, #tpu.memory_space<vmem>>) attributes {dimension_semantics = [#tpu.dimension_semantics<parallel>, #tpu.dimension_semantics<arbitrary>], iteration_bounds = array<i64: 2, 1>, scalar_prefetch = 0 : i64, scratch_operands = 0 : i64, tpu.core_type = #tpu.core_type<tc>, window_params = [{transform_indices = @transform_0, window_bounds = array<i64: 512, 16>}, {pipeline_mode = #tpu.pipeline_mode<synchronous>, transform_indices = @transform_1, window_bounds = array<i64: 16, 128>}, {transform_indices = @transform_2, window_bounds = array<i64: 1, 16, 128>}]} {
    %c0 = arith.constant 0 : index
    %c0_0 = arith.constant 0 : index
    %0 = vector.load %arg2[%c0, %c0_0] : memref<512x16xf32, #tpu.memory_space<vmem>>, vector<512x16xf32>
    %c0_1 = arith.constant 0 : index
    %c0_2 = arith.constant 0 : index
    %1 = vector.load %arg3[%c0_1, %c0_2] : memref<16x128xf32, #tpu.memory_space<vmem>>, vector<16x128xf32>
    %cst = arith.constant dense<0.000000e+00> : vector<512x128xf32>
    %2 = tpu.matmul %0, %1, %cst {dimension_numbers = #tpu.dot_dimension_numbers<[1], [0], [0], [1], [0, 0, 1, 1], [], []>} : vector<512x16xf32>, vector<16x128xf32>, vector<512x128xf32> -> vector<512x128xf32>
    %3 = vector.shape_cast %2 : vector<512x128xf32> to vector<64x8x128xf32>
    %cst_3 = arith.constant dense<0.000000e+00> : vector<8x128xf32>
    %4 = vector.multi_reduction <add>, %3, %cst_3 [0] : vector<64x8x128xf32> to vector<8x128xf32>
    %5 = arith.mulf %2, %2 : vector<512x128xf32>
    %6 = vector.shape_cast %5 : vector<512x128xf32> to vector<64x8x128xf32>
    %cst_4 = arith.constant dense<0.000000e+00> : vector<8x128xf32>
    %7 = vector.multi_reduction <add>, %6, %cst_4 [0] : vector<64x8x128xf32> to vector<8x128xf32>
    %c0_i32 = arith.constant 0 : i32
    %8 = arith.cmpi eq, %arg1, %c0_i32 : i32
    %9 = arith.extui %8 : i1 to i32
    %c0_i32_5 = arith.constant 0 : i32
    %10 = arith.cmpi ne, %9, %c0_i32_5 : i32
    scf.if %10 {
      %cst_17 = arith.constant 0.000000e+00 : f32
      %23 = vector.broadcast %cst_17 : f32 to vector<16x128xf32>
      %c0_18 = arith.constant 0 : index
      %c0_19 = arith.constant 0 : index
      %c0_20 = arith.constant 0 : index
      %24 = vector.load %arg4[%c0_18, %c0_19, %c0_20] : memref<1x16x128xf32, #tpu.memory_space<vmem>>, vector<1x16x128xf32>
      %25 = vector.shape_cast %24 : vector<1x16x128xf32> to vector<16x128xf32>
      %26 = vector.shape_cast %23 : vector<16x128xf32> to vector<1x16x128xf32>
      tpu.vector_store %arg4[%c0_18, %c0_19, %c0_20], %26 {strides = array<i32>} : memref<1x16x128xf32, #tpu.memory_space<vmem>>, vector<1x16x128xf32>,
    } else {
    }
    %c0_6 = arith.constant 0 : index
    %c0_7 = arith.constant 0 : index
    %c0_8 = arith.constant 0 : index
    %11 = vector.load %arg4[%c0_6, %c0_7, %c0_8] : memref<1x16x128xf32, #tpu.memory_space<vmem>>, vector<1x8x128xf32>
    %12 = vector.shape_cast %11 : vector<1x8x128xf32> to vector<8x128xf32>
    %13 = arith.addf %12, %4 : vector<8x128xf32>
    %c0_9 = arith.constant 0 : index
    %c0_10 = arith.constant 0 : index
    %c0_11 = arith.constant 0 : index
    %14 = vector.load %arg4[%c0_9, %c0_10, %c0_11] : memref<1x16x128xf32, #tpu.memory_space<vmem>>, vector<1x8x128xf32>
    %15 = vector.shape_cast %14 : vector<1x8x128xf32> to vector<8x128xf32>
    %16 = vector.shape_cast %13 : vector<8x128xf32> to vector<1x8x128xf32>
    tpu.vector_store %arg4[%c0_9, %c0_10, %c0_11], %16 {strides = array<i32>} : memref<1x16x128xf32, #tpu.memory_space<vmem>>, vector<1x8x128xf32>,
    %c0_12 = arith.constant 0 : index
    %c8 = arith.constant 8 : index
    %c0_13 = arith.constant 0 : index
    %17 = vector.load %arg4[%c0_12, %c8, %c0_13] : memref<1x16x128xf32, #tpu.memory_space<vmem>>, vector<1x8x128xf32>
    %18 = vector.shape_cast %17 : vector<1x8x128xf32> to vector<8x128xf32>
    %19 = arith.addf %18, %7 : vector<8x128xf32>
    %c0_14 = arith.constant 0 : index
    %c8_15 = arith.constant 8 : index
    %c0_16 = arith.constant 0 : index
    %20 = vector.load %arg4[%c0_14, %c8_15, %c0_16] : memref<1x16x128xf32, #tpu.memory_space<vmem>>, vector<1x8x128xf32>
    %21 = vector.shape_cast %20 : vector<1x8x128xf32> to vector<8x128xf32>
    %22 = vector.shape_cast %19 : vector<8x128xf32> to vector<1x8x128xf32>
    tpu.vector_store %arg4[%c0_14, %c8_15, %c0_16], %22 {strides = array<i32>} : memref<1x16x128xf32, #tpu.memory_space<vmem>>, vector<1x8x128xf32>,
    return
  }
  func.func @transform_0(%arg0: i32, %arg1: i32) -> (i32, i32) {
    %c1_i32 = arith.constant 1 : i32
    %0 = arith.muli %arg0, %c1_i32 : i32
    %1 = arith.addi %0, %arg1 : i32
    %c0_i32 = arith.constant 0 : i32
    %c0_i32_0 = arith.constant 0 : i32
    return %1, %c0_i32 : i32, i32
  }
  func.func @transform_1(%arg0: i32, %arg1: i32) -> (i32, i32) {
    %c0_i32 = arith.constant 0 : i32
    %c0_i32_0 = arith.constant 0 : i32
    %c0_i32_1 = arith.constant 0 : i32
    return %c0_i32, %c0_i32_0 : i32, i32
  }
  func.func @transform_2(%arg0: i32, %arg1: i32) -> (i32, i32, i32) {
    %c0_i32 = arith.constant 0 : i32
    %c0_i32_0 = arith.constant 0 : i32
    %c0_i32_1 = arith.constant 0 : i32
    return %arg0, %c0_i32, %c0_i32_0 : i32, i32, i32
  }
}

</mosaic_0001>

<bundles_post_ra>
// kernel: tpu_custom_call.1
= control target key start
LH: loop header
LB: loop body
LE: loop exit
PB: predicated region body
PF: predicated region fallthrough
CT: control target
= control target key end

     0   :  { %7 = vsyncpa [#allocation3], 0  ;;  %s1824_s0 = inlined_call_operand.vmem [shape: f32[1024,16], index: 0, kind: input, shape index: {}]   ;;  %s1825_s1 = inlined_call_operand.vmem [shape: f32[16,128], index: 1, kind: input, shape index: {}]   ;;  %s1826_s2 = inlined_call_operand.hbm [shape: f32[2,16,128], index: 2, kind: output, shape index: {}]  }
   0x1   :  { %9 = vsyncpa [#allocation3 + $0x1], 0  ;;  %s1495_s9 = smov 0   ;;  %s1497_s10 = smov 0  }
   0x2   :  { %s1499_s11 = smov 0   ;;  %s1501_s12 = smov 0  }
   0x3   :  { %s1503_s13 = smov 0   ;;  %s1505_s14 = smov 0  }
   0x4 LB: > { %s1093_s15 = sadd.s32 4294967295, %s1475_s14   ;;  %s1094_s16 = sadd.s32 4294967294, %s1475_s14   ;;  %s1475_s14 = sphi %s1505_s14, %s15_s14   ;;  %s1471_s13 = sphi %s1503_s13, %s1833_s13   ;;  %s1467_s12 = sphi %s1501_s12, %s1832_s12   ;;  %s1463_s11 = sphi %s1499_s11, %s1831_s11   ;;  %s1459_s10 = sphi %s1497_s10, %s1830_s10   ;;  %s1455_s9 = sphi %s1495_s9, %s1829_s9  }
   0x5   : > { %s27_s17 = sadd.s32 1, %s1471_s13  ;;  %s83_s18 = sadd.s32 1, %s1463_s11 }
   0x6   : > { %p29_p0 = scmp.ge.s32.totalorder %s27_s17, 2  ;;  %p93_p1 = scmp.ne.s32.totalorder %s1463_s11, %s1459_s10 }
   0x7   : > { %p94_p2 = scmp.eq.s32.totalorder %s1093_s15, 1  ;;  %p99_p3 = scmp.ne.s32.totalorder %s1459_s10, %s1455_s9 }
   0x8   : > { %s1835_s17 = smov (%p29_p0, %s27_s17), 0  ;;  %p100_p5 = scmp.eq.s32.totalorder %s1094_s16, 1 }
   0x9   : > { %p1535_p4 = por %p94_p2, %p93_p1  ;;  %s80_s20 = ssub.s32 %s1471_s13, %s1835_s17 }
   0xa   : > { %p1097_p6 = scmp.ge.s32.totalorder %s1475_s14, 1  ;;  %p81_p7 = scmp.eq.s32.totalorder %s80_s20, 0 }
   0xb   : > { %p1542_p8 = por %p100_p5, %p99_p3  ;;  %p132_p9 = scmp.lt.s32.totalorder %s1475_s14, 3 }
   0xc   : > { %s1548_s22 = scalar_select %p81_p7, %s1463_s11, %s83_s18  }
   0xd   : > { %p133_p10 = pnand %p1097_p6, %p132_p9 }
   0xe   : > { %s1099_s27 = sshll.u32 (!%p133_p10), %s1467_s12, 6  ;;  %s152_s4 = sand.u32 (!%p133_p10), 1, %s1459_s10  }
   0xf   : > { %136 = sbr.rel (%p133_p10) target bundleno = 365 (0x16d), region = 28  ;;  %p157_p11 = scmp.lt.s32.totalorder (!%p133_p10), %s1099_s27, 127 }
  0x10   : > { %s1098_s5 = sshll.u32 (!%p133_p10), %s152_s4, 4  ;;  %s1170_s6 = sshll.u32 (!%p133_p10), %s1467_s12, 8 }
  0x11   : > { %s154_s7 = scalar_lea.vmem (!%p133_p10), [#allocation2], %s1098_s5  ;;  %s1775_s18 = scalar_lea.hbm (!%p133_p10), %s1826_s2, %s1170_s6 }
  0x12   : > { %s1023_s8 = sshll.u32 (!%p133_p10), %s154_s7, 4  ;;  %s1779_s20 = scalar_lea.sflag (!%p133_p10), [#allocation3], %s152_s4  ;;  %s1777_s8 = int_to_ptr.vmem [resolvable:$true] %s1023_s8 }
  0x13   : > { %s1399_s23 = scalar_lea.vmem (!%p133_p10), %s1777_s8, 256  ;;  %s1477_s12 = smov (!%p133_p10), [#allocation2]  }
  0x14   : > { %v228_v0 = vld [vmem:[%s1825_s1 + $0x8] sm:$0xff]  ;;  %v227_v1 = vld [vmem:[%s1825_s1] sm:$0xff]  ;;  %s1837_s27 = smov (!%p157_p11, %s1099_s27), 127  ;;  %vm229_vm0 = vcmask 130048   ;;  %p1400_p12 = scmp.ne.s32.totalorder %s1777_s8, %s1399_s23 }
  0x15   : > { %1237 = vmatprep.subr.mxu0 %v228_v0  ;;  %1337 = vmatprep.subr.mxu1 %v228_v0  ;;  %s1100_s28 = sshll.u32 %s1837_s27, 3  ;;  %s1403_s24 = sshll.u32 %s1477_s12, 4  ;;  %s1404_s24 = int_to_ptr.vmem [resolvable:$false] %s1403_s24 }
  0x16   : > { %1238 = vmatpush3.msra.mxu0 %v228_v0  ;;  %1339 = vmatpush3.msra.mxu1 %v228_v0  ;;  %s1560_s3 = scalar_lea.vmem %s1824_s0, %s1100_s28  ;;  %p1401_p13 = pnand %p1400_p12, %p1535_p4 }
  0x17   : > { %1239 = vmatprep.subr.mxu0 %v227_v1  ;;  %1338 = vmatprep.subr.mxu1 %v227_v1  ;;  %v163_v2 = vld [vmem:[%s1560_s3] sm:$0xff]  ;;  %v164_v3 = vld [vmem:[%s1560_s3 + $0x8] sm:$0xff]  ;;  %v165_v4 = vld [vmem:[%s1560_s3 + $0x10] sm:$0xff]  ;;  %s1405_s25 = scalar_lea.vmem %s1404_s24, 512  ;;  %p1406_p1 = scmp.lt.s32.totalorder %s1777_s8, %s1404_s24 }
  0x18   : > { %1240 = vmatpush3.msra.mxu0 %v227_v1  ;;  %1340 = vmatpush3.msra.mxu1 %v227_v1  ;;  %v166_v5 = vld [vmem:[%s1560_s3 + $0x18] sm:$0xff]  ;;  %v167_v6 = vld [vmem:[%s1560_s3 + $0x20] sm:$0xff]  ;;  %v168_v7 = vld [vmem:[%s1560_s3 + $0x28] sm:$0xff]  ;;  %p1402_p0 = pneg %p1401_p13  ;;  %p1407_p2 = scmp.lt.s32.totalorder %s1405_s25, %s1399_s23 }
  0x19   : > { %1241 = vmatprep.mubr.msk.f32.mxu0 %vm229_vm0, %v163_v2  ;;  %v169_v8 = vld [vmem:[%s1560_s3 + $0x30] sm:$0xff]  ;;  %v195_v9 = vld [vmem:[%s1560_s3 + $0x100] sm:$0xff]  ;;  %v170_v10 = vld [vmem:[%s1560_s3 + $0x38] sm:$0xff] }
  0x1a   : > { %1242 = vmatmul.mubr.msk.f32.vlgmr.msra.gmra.mxu0 %vm229_vm0, %v164_v3  ;;  %1289 = vmatprep.mubr.msk.f32.mxu1 %vm229_vm0, %v195_v9  ;;  %v196_v11 = vld [vmem:[%s1560_s3 + $0x108] sm:$0xff]  ;;  %v197_v12 = vld [vmem:[%s1560_s3 + $0x110] sm:$0xff]  ;;  %v171_v13 = vld [vmem:[%s1560_s3 + $0x40] sm:$0xff]  ;;  %p1408_p3 = por %p1407_p2, %p1406_p1 }
  0x1b   : > { %1244 = vmatprep.mubr.msk.f32.mxu0 %vm229_vm0, %v165_v4  ;;  %1290 = vmatmul.mubr.msk.f32.vlgmr.msra.gmra.mxu1 %vm229_vm0, %v196_v11  ;;  %v198_v14 = vld [vmem:[%s1560_s3 + $0x118] sm:$0xff]  ;;  %v199_v15 = vld [vmem:[%s1560_s3 + $0x120] sm:$0xff]  ;;  %v172_v16 = vld [vmem:[%s1560_s3 + $0x48] sm:$0xff] }
  0x1c   : > { %1292 = vmatprep.mubr.msk.f32.mxu1 %vm229_vm0, %v197_v12  ;;  %v173_v17 = vld [vmem:[%s1560_s3 + $0x50] sm:$0xff]  ;;  %v200_v18 = vld [vmem:[%s1560_s3 + $0x128] sm:$0xff]  ;;  %v174_v20 = vld [vmem:[%s1560_s3 + $0x58] sm:$0xff]  ;;  %p1409_p5 = pnand %p1408_p3, %p1402_p0 }
  0x1d   : > { %v201_v19 = vld [vmem:[%s1560_s3 + $0x130] sm:$0xff]  ;;  %v175_v21 = vld [vmem:[%s1560_s3 + $0x60] sm:$0xff]  ;;  %v202_v22 = vld [vmem:[%s1560_s3 + $0x138] sm:$0xff] }
  0x1e   : > { %1245 = vmatmul.mubr.msk.f32.gmra.mxu0 %vm229_vm0, %v166_v5  ;;  %v203_v23 = vld [vmem:[%s1560_s3 + $0x140] sm:$0xff]  ;;  %v176_v24 = vld [vmem:[%s1560_s3 + $0x68] sm:$0xff]  ;;  %v177_v25 = vld [vmem:[%s1560_s3 + $0x70] sm:$0xff] }
  0x1f   : > { %1247 = vmatprep.mubr.msk.f32.mxu0 %vm229_vm0, %v167_v6  ;;  %1293 = vmatmul.mubr.msk.f32.gmra.mxu1 %vm229_vm0, %v198_v14  ;;  %v204_v26 = vld [vmem:[%s1560_s3 + $0x148] sm:$0xff]  ;;  %v205_v27 = vld [vmem:[%s1560_s3 + $0x150] sm:$0xff]  ;;  %v178_v28 = vld [vmem:[%s1560_s3 + $0x78] sm:$0xff] }
  0x20   : > { %1295 = vmatprep.mubr.msk.f32.mxu1 %vm229_vm0, %v199_v15  ;;  %v179_v29 = vld [vmem:[%s1560_s3 + $0x80] sm:$0xff]  ;;  %v206_v30 = vld [vmem:[%s1560_s3 + $0x158] sm:$0xff]  ;;  %v180_v32 = vld [vmem:[%s1560_s3 + $0x88] sm:$0xff] }
  0x21   : > { %v207_v31 = vld [vmem:[%s1560_s3 + $0x160] sm:$0xff]  ;;  %v181_v33 = vld [vmem:[%s1560_s3 + $0x90] sm:$0xff]  ;;  %v208_v34 = vld [vmem:[%s1560_s3 + $0x168] sm:$0xff] }
  0x22   : > { %1248 = vmatmul.mubr.msk.f32.gmra.mxu0 %vm229_vm0, %v168_v7  ;;  %v209_v35 = vld [vmem:[%s1560_s3 + $0x170] sm:$0xff]  ;;  %v182_v36 = vld [vmem:[%s1560_s3 + $0x98] sm:$0xff]  ;;  %v183_v37 = vld [vmem:[%s1560_s3 + $0xa0] sm:$0xff] }
  0x23   : > { %1250 = vmatprep.mubr.msk.f32.mxu0 %vm229_vm0, %v169_v8  ;;  %1296 = vmatmul.mubr.msk.f32.gmra.mxu1 %vm229_vm0, %v200_v18  ;;  %v210_v38 = vld [vmem:[%s1560_s3 + $0x178] sm:$0xff]  ;;  %v211_v39 = vld [vmem:[%s1560_s3 + $0x180] sm:$0xff]  ;;  %v184_v40 = vld [vmem:[%s1560_s3 + $0xa8] sm:$0xff] }
  0x24   : > { %1298 = vmatprep.mubr.msk.f32.mxu1 %vm229_vm0, %v201_v19  ;;  %v185_v41 = vld [vmem:[%s1560_s3 + $0xb0] sm:$0xff]  ;;  %v212_v42 = vld [vmem:[%s1560_s3 + $0x188] sm:$0xff]  ;;  %v186_v44 = vld [vmem:[%s1560_s3 + $0xb8] sm:$0xff] }
  0x25   : > { %v213_v43 = vld [vmem:[%s1560_s3 + $0x190] sm:$0xff]  ;;  %v187_v45 = vld [vmem:[%s1560_s3 + $0xc0] sm:$0xff]  ;;  %v214_v46 = vld [vmem:[%s1560_s3 + $0x198] sm:$0xff] }
  0x26   : > { %1251 = vmatmul.mubr.msk.f32.gmra.mxu0 %vm229_vm0, %v170_v10  ;;  %v215_v47 = vld [vmem:[%s1560_s3 + $0x1a0] sm:$0xff]  ;;  %v188_v48 = vld [vmem:[%s1560_s3 + $0xc8] sm:$0xff]  ;;  %v189_v49 = vld [vmem:[%s1560_s3 + $0xd0] sm:$0xff] }
  0x27   : > { %1253 = vmatprep.mubr.msk.f32.mxu0 %vm229_vm0, %v171_v13  ;;  %1299 = vmatmul.mubr.msk.f32.gmra.mxu1 %vm229_vm0, %v202_v22  ;;  %v216_v50 = vld [vmem:[%s1560_s3 + $0x1a8] sm:$0xff]  ;;  %v217_v51 = vld [vmem:[%s1560_s3 + $0x1b0] sm:$0xff]  ;;  %v190_v52 = vld [vmem:[%s1560_s3 + $0xd8] sm:$0xff] }
  0x28   : > { %1301 = vmatprep.mubr.msk.f32.mxu1 %vm229_vm0, %v203_v23  ;;  %v191_v53 = vld [vmem:[%s1560_s3 + $0xe0] sm:$0xff]  ;;  %v218_v54 = vld [vmem:[%s1560_s3 + $0x1b8] sm:$0xff]  ;;  %v192_v56 = vld [vmem:[%s1560_s3 + $0xe8] sm:$0xff] }
  0x29   : > { %v219_v55 = vld [vmem:[%s1560_s3 + $0x1c0] sm:$0xff]  ;;  %v193_v57 = vld [vmem:[%s1560_s3 + $0xf0] sm:$0xff]  ;;  %v220_v58 = vld [vmem:[%s1560_s3 + $0x1c8] sm:$0xff] }
  0x2a   : > { %1254 = vmatmul.mubr.msk.f32.gmra.mxu0 %vm229_vm0, %v172_v16  ;;  %v221_v59 = vld [vmem:[%s1560_s3 + $0x1d0] sm:$0xff]  ;;  %v194_v60 = vld [vmem:[%s1560_s3 + $0xf8] sm:$0xff]  ;;  %v223_v62 = vld [vmem:[%s1560_s3 + $0x1e0] sm:$0xff] }
  0x2b   : > { %1256 = vmatprep.mubr.msk.f32.mxu0 %vm229_vm0, %v173_v17  ;;  %1302 = vmatmul.mubr.msk.f32.gmra.mxu1 %vm229_vm0, %v204_v26  ;;  %v222_v61 = vld [vmem:[%s1560_s3 + $0x1d8] sm:$0xff]  ;;  %v224_v63 = vld [vmem:[%s1560_s3 + $0x1e8] sm:$0xff]  ;;  %v225_v0 = vld [vmem:[%s1560_s3 + $0x1f0] sm:$0xff] }
  0x2c   : > { %1304 = vmatprep.mubr.msk.f32.mxu1 %vm229_vm0, %v205_v27  ;;  %v226_v1 = vld [vmem:[%s1560_s3 + $0x1f8] sm:$0xff] }
  0x2e   : > { %1257 = vmatmul.mubr.msk.f32.gmra.mxu0 %vm229_vm0, %v174_v20 }
  0x2f   : > { %1259 = vmatprep.mubr.msk.f32.mxu0 %vm229_vm0, %v175_v21  ;;  %1305 = vmatmul.mubr.msk.f32.gmra.mxu1 %vm229_vm0, %v206_v30 }
  0x30   : > { %1307 = vmatprep.mubr.msk.f32.mxu1 %vm229_vm0, %v207_v31 }
  0x32   : > { %1260 = vmatmul.mubr.msk.f32.gmra.mxu0 %vm229_vm0, %v176_v24 }
  0x33   : > { %1262 = vmatprep.mubr.msk.f32.mxu0 %vm229_vm0, %v177_v25  ;;  %1308 = vmatmul.mubr.msk.f32.gmra.mxu1 %vm229_vm0, %v208_v34 }
  0x34   : > { %1310 = vmatprep.mubr.msk.f32.mxu1 %vm229_vm0, %v209_v35 }
  0x36   : > { %1263 = vmatmul.mubr.msk.f32.gmra.mxu0 %vm229_vm0, %v178_v28 }
  0x37   : > { %1265 = vmatprep.mubr.msk.f32.mxu0 %vm229_vm0, %v179_v29  ;;  %1311 = vmatmul.mubr.msk.f32.gmra.mxu1 %vm229_vm0, %v210_v38 }
  0x38   : > { %1313 = vmatprep.mubr.msk.f32.mxu1 %vm229_vm0, %v211_v39 }
  0x3a   : > { %1266 = vmatmul.mubr.msk.f32.gmra.mxu0 %vm229_vm0, %v180_v32 }
  0x3b   : > { %1268 = vmatprep.mubr.msk.f32.mxu0 %vm229_vm0, %v181_v33  ;;  %1314 = vmatmul.mubr.msk.f32.gmra.mxu1 %vm229_vm0, %v212_v42 }
  0x3c   : > { %1316 = vmatprep.mubr.msk.f32.mxu1 %vm229_vm0, %v213_v43 }
  0x3e   : > { %1269 = vmatmul.mubr.msk.f32.gmra.mxu0 %vm229_vm0, %v182_v36 }
  0x3f   : > { %1271 = vmatprep.mubr.msk.f32.mxu0 %vm229_vm0, %v183_v37  ;;  %1317 = vmatmul.mubr.msk.f32.gmra.mxu1 %vm229_vm0, %v214_v46 }
  0x40   : > { %1319 = vmatprep.mubr.msk.f32.mxu1 %vm229_vm0, %v215_v47 }
  0x42   : > { %1272 = vmatmul.mubr.msk.f32.gmra.mxu0 %vm229_vm0, %v184_v40 }
  0x43   : > { %1274 = vmatprep.mubr.msk.f32.mxu0 %vm229_vm0, %v185_v41  ;;  %1320 = vmatmul.mubr.msk.f32.gmra.mxu1 %vm229_vm0, %v216_v50 }
  0x44   : > { %1322 = vmatprep.mubr.msk.f32.mxu1 %vm229_vm0, %v217_v51 }
  0x46   : > { %1275 = vmatmul.mubr.msk.f32.gmra.mxu0 %vm229_vm0, %v186_v44 }
  0x47   : > { %1277 = vmatprep.mubr.msk.f32.mxu0 %vm229_vm0, %v187_v45  ;;  %1323 = vmatmul.mubr.msk.f32.gmra.mxu1 %vm229_vm0, %v218_v54 }
  0x48   : > { %1325 = vmatprep.mubr.msk.f32.mxu1 %vm229_vm0, %v219_v55 }
  0x4a   : > { %1278 = vmatmul.mubr.msk.f32.gmra.mxu0 %vm229_vm0, %v188_v48 }
  0x4b   : > { %1280 = vmatprep.mubr.msk.f32.mxu0 %vm229_vm0, %v189_v49  ;;  %1326 = vmatmul.mubr.msk.f32.gmra.mxu1 %vm229_vm0, %v220_v58 }
  0x4c   : > { %1328 = vmatprep.mubr.msk.f32.mxu1 %vm229_vm0, %v221_v59 }
  0x4e   : > { %1281 = vmatmul.mubr.msk.f32.gmra.mxu0 %vm229_vm0, %v190_v52 }
  0x4f   : > { %1283 = vmatprep.mubr.msk.f32.mxu0 %vm229_vm0, %v191_v53  ;;  %1329 = vmatmul.mubr.msk.f32.gmra.mxu1 %vm229_vm0, %v222_v61 }
  0x50   : > { %1331 = vmatprep.mubr.msk.f32.mxu1 %vm229_vm0, %v223_v62 }
  0x52   : > { %1284 = vmatmul.mubr.msk.f32.gmra.mxu0 %vm229_vm0, %v192_v56 }
  0x53   : > { %1286 = vmatprep.mubr.msk.f32.mxu0 %vm229_vm0, %v193_v57  ;;  %1332 = vmatmul.mubr.msk.f32.gmra.mxu1 %vm229_vm0, %v224_v63 }
  0x54   : > { %1334 = vmatprep.mubr.msk.f32.mxu1 %vm229_vm0, %v225_v0 }
  0x56   : > { %1287 = vmatmul.mubr.msk.f32.gmra.mxu0 %vm229_vm0, %v194_v60 }
  0x57   : > { %1335 = vmatmul.mubr.msk.f32.gmra.mxu1 %vm229_vm0, %v226_v1 }
  0xda   : > { %v1243_v2 = vpop.f32.mrf.mxu0 }
  0xdb   : > { %v871_v6 = vmul.f32 %v1243_v2, %v1243_v2  ;;  %v1690_v17 = vpop.f32.mrf.mxu1 }
  0xdc   : > { %v488_v3 = vpop.f32.mrf.mxu0 }
  0xdd   : > { %v870_v4 = vmul.f32 %v488_v3, %v488_v3  ;;  %v807_v7 = vadd.f32 %v1243_v2, %v488_v3  ;;  %v1692_v22 = vpop.f32.mrf.mxu1 }
  0xde   : > { %v1246_v5 = vpop.f32.mrf.mxu0 }
  0xdf   : > { %v934_v9 = vadd.f32 %v871_v6, %v870_v4  ;;  %v873_v13 = vmul.f32 %v1246_v5, %v1246_v5  ;;  %v1694_v27 = vpop.f32.mrf.mxu1 }
  0xe0   : > { %v498_v8 = vpop.f32.mrf.mxu0 }
  0xe1   : > { %v808_v10 = vadd.f32 %v807_v7, %v498_v8  ;;  %v872_v11 = vmul.f32 %v498_v8, %v498_v8  ;;  %v1696_v32 = vpop.f32.mrf.mxu1 }
  0xe2   : > { %v1249_v12 = vpop.f32.mrf.mxu0 }
  0xe3   : > { %v935_v14 = vadd.f32 %v934_v9, %v872_v11  ;;  %v809_v15 = vadd.f32 %v1246_v5, %v808_v10  ;;  %v875_v23 = vmul.f32 %v1249_v12, %v1249_v12  ;;  %v1698_v37 = vpop.f32.mrf.mxu1 }
  0xe4   : > { %v508_v16 = vpop.f32.mrf.mxu0 }
  0xe5   : > { %v810_v18 = vadd.f32 %v809_v15, %v508_v16  ;;  %v874_v19 = vmul.f32 %v508_v16, %v508_v16  ;;  %v936_v20 = vadd.f32 %v935_v14, %v873_v13  ;;  %v1700_v42 = vpop.f32.mrf.mxu1 }
  0xe6   : > { %v1252_v21 = vpop.f32.mrf.mxu0 }
  0xe7   : > { %v937_v24 = vadd.f32 %v936_v20, %v874_v19  ;;  %v811_v25 = vadd.f32 %v1249_v12, %v810_v18  ;;  %v877_v33 = vmul.f32 %v1252_v21, %v1252_v21  ;;  %v1702_v51 = vpop.f32.mrf.mxu1 }
  0xe8   : > { %v518_v26 = vpop.f32.mrf.mxu0 }
  0xe9   : > { %v812_v28 = vadd.f32 %v811_v25, %v518_v26  ;;  %v876_v29 = vmul.f32 %v518_v26, %v518_v26  ;;  %v938_v30 = vadd.f32 %v937_v24, %v875_v23  ;;  %v1704_v60 = vpop.f32.mrf.mxu1 }
  0xea   : > { %v1255_v31 = vpop.f32.mrf.mxu0 }
  0xeb   : > { %v939_v34 = vadd.f32 %v938_v30, %v876_v29  ;;  %v813_v35 = vadd.f32 %v1252_v21, %v812_v28  ;;  %v879_v43 = vmul.f32 %v1255_v31, %v1255_v31  ;;  %v1706_v5 = vpop.f32.mrf.mxu1 }
  0xec   : > { %v528_v36 = vpop.f32.mrf.mxu0 }
  0xed   : > { %v814_v38 = vadd.f32 %v813_v35, %v528_v36  ;;  %v878_v39 = vmul.f32 %v528_v36, %v528_v36  ;;  %v940_v40 = vadd.f32 %v939_v34, %v877_v33  ;;  %v1708_v14 = vpop.f32.mrf.mxu1 }
  0xee   : > { %v1258_v41 = vpop.f32.mrf.mxu0 }
  0xef   : > { %v941_v44 = vadd.f32 %v940_v40, %v878_v39  ;;  %v815_v45 = vadd.f32 %v1255_v31, %v814_v38  ;;  %v881_v52 = vmul.f32 %v1258_v41, %v1258_v41  ;;  %v1710_v25 = vpop.f32.mrf.mxu1 }
  0xf0   : > { %v538_v46 = vpop.f32.mrf.mxu0 }
  0xf1   : > { %v816_v47 = vadd.f32 %v815_v45, %v538_v46  ;;  %v880_v48 = vmul.f32 %v538_v46, %v538_v46  ;;  %v942_v49 = vadd.f32 %v941_v44, %v879_v43  ;;  %v1712_v36 = vpop.f32.mrf.mxu1 }
  0xf2   : > { %v1261_v50 = vpop.f32.mrf.mxu0 }
  0xf3   : > { %v943_v53 = vadd.f32 %v942_v49, %v880_v48  ;;  %v817_v54 = vadd.f32 %v1258_v41, %v816_v47  ;;  %v883_v61 = vmul.f32 %v1261_v50, %v1261_v50  ;;  %v1714_v47 = vpop.f32.mrf.mxu1 }
  0xf4   : > { %v548_v55 = vpop.f32.mrf.mxu0 }
  0xf5   : > { %v818_v56 = vadd.f32 %v817_v54, %v548_v55  ;;  %v882_v57 = vmul.f32 %v548_v55, %v548_v55  ;;  %v944_v58 = vadd.f32 %v943_v53, %v881_v52 }
  0xf6   : > { %v1264_v59 = vpop.f32.mrf.mxu0 }
  0xf7   : > { %v945_v62 = vadd.f32 %v944_v58, %v882_v57  ;;  %v819_v63 = vadd.f32 %v1261_v50, %v818_v56  ;;  %v885_v6 = vmul.f32 %v1264_v59, %v1264_v59  ;;  %v1716_v57 = vpop.f32.mrf.mxu1 }
  0xf8   : > { %v558_v0 = vpop.f32.mrf.mxu0 }
  0xf9   : > { %v820_v1 = vadd.f32 %v819_v63, %v558_v0  ;;  %v884_v2 = vmul.f32 %v558_v0, %v558_v0  ;;  %v946_v3 = vadd.f32 %v945_v62, %v883_v61 }
  0xfa   : > { %v1267_v4 = vpop.f32.mrf.mxu0 }
  0xfb   : > { %v947_v7 = vadd.f32 %v946_v3, %v884_v2  ;;  %v821_v8 = vadd.f32 %v1264_v59, %v820_v1  ;;  %v887_v15 = vmul.f32 %v1267_v4, %v1267_v4  ;;  %v1718_v3 = vpop.f32.mrf.mxu1 }
  0xfc   : > { %v568_v9 = vpop.f32.mrf.mxu0 }
  0xfd   : > { %v822_v10 = vadd.f32 %v821_v8, %v568_v9  ;;  %v886_v11 = vmul.f32 %v568_v9, %v568_v9  ;;  %v948_v12 = vadd.f32 %v947_v7, %v885_v6 }
  0xfe   : > { %v1270_v13 = vpop.f32.mrf.mxu0 }
  0xff   : > { %v949_v16 = vadd.f32 %v948_v12, %v886_v11  ;;  %v823_v18 = vadd.f32 %v1267_v4, %v822_v10  ;;  %v889_v26 = vmul.f32 %v1270_v13, %v1270_v13 }
 0x100   : > { %v578_v19 = vpop.f32.mrf.mxu0 }
 0x101   : > { %v824_v20 = vadd.f32 %v823_v18, %v578_v19  ;;  %v888_v21 = vmul.f32 %v578_v19, %v578_v19  ;;  %v950_v23 = vadd.f32 %v949_v16, %v887_v15 }
 0x102   : > { %v1273_v24 = vpop.f32.mrf.mxu0 }
 0x103   : > { %v951_v28 = vadd.f32 %v950_v23, %v888_v21  ;;  %v825_v29 = vadd.f32 %v1270_v13, %v824_v20  ;;  %v891_v38 = vmul.f32 %v1273_v24, %v1273_v24  ;;  %v718_v13 = vpop.f32.mrf.mxu1 }
 0x104   : > { %v588_v30 = vpop.f32.mrf.mxu0 }
 0x105   : > { %v826_v31 = vadd.f32 %v825_v29, %v588_v30  ;;  %v890_v33 = vmul.f32 %v588_v30, %v588_v30  ;;  %v952_v34 = vadd.f32 %v951_v28, %v889_v26 }
 0x106   : > { %v1276_v35 = vpop.f32.mrf.mxu0 }
 0x107   : > { %v953_v39 = vadd.f32 %v952_v34, %v890_v33  ;;  %v827_v40 = vadd.f32 %v1273_v24, %v826_v31  ;;  %v893_v48 = vmul.f32 %v1276_v35, %v1276_v35  ;;  %v1720_v24 = vpop.f32.mrf.mxu1  ;;  %v902_v33 = vmul.f32 %v1692_v22, %v1692_v22 }
 0x108   : > { %v598_v41 = vpop.f32.mrf.mxu0 }
 0x109   : > { %v828_v43 = vadd.f32 %v827_v40, %v598_v41  ;;  %v892_v44 = vmul.f32 %v598_v41, %v598_v41  ;;  %v954_v45 = vadd.f32 %v953_v39, %v891_v38  ;;  %v728_v34 = vpop.f32.mrf.mxu1  ;;  %v904_v41 = vmul.f32 %v1696_v32, %v1696_v32 }
 0x10a   : > { %v1279_v46 = vpop.f32.mrf.mxu0 }
 0x10b   : > { %v955_v49 = vadd.f32 %v954_v45, %v892_v44  ;;  %v829_v50 = vadd.f32 %v1276_v35, %v828_v43  ;;  %v895_v58 = vmul.f32 %v1279_v46, %v1279_v46  ;;  %v903_v35 = vmul.f32 %v1690_v17, %v1690_v17  ;;  %v1318_v44 = vpop.f32.mrf.mxu1 }
 0x10c   : > { %v608_v52 = vpop.f32.mrf.mxu0  ;;  %v905_v45 = vmul.f32 %v1694_v27, %v1694_v27 }
 0x10d   : > { %v830_v53 = vadd.f32 %v829_v50, %v608_v52  ;;  %v894_v54 = vmul.f32 %v608_v52, %v608_v52  ;;  %v956_v55 = vadd.f32 %v955_v49, %v893_v48  ;;  %v906_v49 = vmul.f32 %v1700_v42, %v1700_v42 }
 0x10e   : > { %v1282_v56 = vpop.f32.mrf.mxu0  ;;  %v907_v52 = vmul.f32 %v1698_v37, %v1698_v37 }
 0x10f   : > { %v957_v59 = vadd.f32 %v956_v55, %v894_v54  ;;  %v831_v61 = vadd.f32 %v1279_v46, %v830_v53  ;;  %v897_v4 = vmul.f32 %v1282_v56, %v1282_v56  ;;  %v908_v55 = vmul.f32 %v1704_v60, %v1704_v60 }
 0x110   : > { %v618_v62 = vpop.f32.mrf.mxu0 }
 0x111   : > { %v832_v63 = vadd.f32 %v831_v61, %v618_v62  ;;  %v896_v0 = vmul.f32 %v618_v62, %v618_v62  ;;  %v958_v1 = vadd.f32 %v957_v59, %v895_v58  ;;  %v909_v58 = vmul.f32 %v1702_v51, %v1702_v51 }
 0x112   : > { %v1285_v2 = vpop.f32.mrf.mxu0  ;;  %v910_v62 = vmul.f32 %v1708_v14, %v1708_v14 }
 0x113   : > { %v959_v6 = vadd.f32 %v958_v1, %v896_v0  ;;  %v833_v7 = vadd.f32 %v1282_v56, %v832_v63  ;;  %v899_v15 = vmul.f32 %v1285_v2, %v1285_v2  ;;  %v911_v0 = vmul.f32 %v1706_v5, %v1706_v5 }
 0x114   : > { %v628_v8 = vpop.f32.mrf.mxu0 }
 0x115   : > { %v834_v9 = vadd.f32 %v833_v7, %v628_v8  ;;  %v898_v10 = vmul.f32 %v628_v8, %v628_v8  ;;  %v960_v11 = vadd.f32 %v959_v6, %v897_v4  ;;  %v912_v4 = vmul.f32 %v1712_v36, %v1712_v36 }
 0x116   : > { %v1288_v12 = vpop.f32.mrf.mxu0  ;;  %v913_v7 = vmul.f32 %v1710_v25, %v1710_v25 }
 0x117   : > { %v961_v16 = vadd.f32 %v960_v11, %v898_v10  ;;  %v835_v18 = vadd.f32 %v1285_v2, %v834_v9  ;;  %v901_v26 = vmul.f32 %v1288_v12, %v1288_v12  ;;  %v914_v10 = vmul.f32 %v1716_v57, %v1716_v57 }
 0x118   : > { %v638_v19 = vpop.f32.mrf.mxu0 }
 0x119   : > { %v836_v20 = vadd.f32 %v835_v18, %v638_v19  ;;  %v900_v21 = vmul.f32 %v638_v19, %v638_v19  ;;  %v962_v23 = vadd.f32 %v961_v16, %v899_v15  ;;  %v916_v18 = vmul.f32 %v718_v13, %v718_v13 }
 0x11b   : > { %v837_v28 = vadd.f32 %v1288_v12, %v836_v20  ;;  %v963_v29 = vadd.f32 %v962_v23, %v900_v21  ;;  %v915_v12 = vmul.f32 %v1714_v47, %v1714_v47 }
 0x11d   : > { %v964_v30 = vadd.f32 %v963_v29, %v901_v26  ;;  %v838_v31 = vadd.f32 %v837_v28, %v1692_v22 }
 0x11f   : > { %v965_v38 = vadd.f32 %v964_v30, %v902_v33  ;;  %v839_v39 = vadd.f32 %v1690_v17, %v838_v31  ;;  %v738_v17 = vpop.f32.mrf.mxu1  ;;  %v919_v30 = vmul.f32 %v1720_v24, %v1720_v24 }
 0x121   : > { %v840_v40 = vadd.f32 %v839_v39, %v1696_v32  ;;  %v966_v43 = vadd.f32 %v965_v38, %v903_v35  ;;  %v921_v39 = vmul.f32 %v1318_v44, %v1318_v44 }
 0x123   : > { %v967_v46 = vadd.f32 %v966_v43, %v904_v41  ;;  %v841_v22 = vadd.f32 %v1694_v27, %v840_v40  ;;  %v1321_v27 = vpop.f32.mrf.mxu1 }
 0x125   : > { %v842_v48 = vadd.f32 %v841_v22, %v1700_v42  ;;  %v968_v50 = vadd.f32 %v967_v46, %v905_v45 }
 0x127   : > { %v969_v53 = vadd.f32 %v968_v50, %v906_v49  ;;  %v843_v32 = vadd.f32 %v1698_v37, %v842_v48  ;;  %v748_v37 = vpop.f32.mrf.mxu1 }
 0x128   : > { %v922_v45 = vmul.f32 %v748_v37, %v748_v37 }
 0x129   : > { %v844_v54 = vadd.f32 %v843_v32, %v1704_v60  ;;  %v970_v56 = vadd.f32 %v969_v53, %v907_v52 }
 0x12b   : > { %v971_v59 = vadd.f32 %v970_v56, %v908_v55  ;;  %v845_v42 = vadd.f32 %v1702_v51, %v844_v54  ;;  %v1324_v51 = vpop.f32.mrf.mxu1 }
 0x12d   : > { %v846_v61 = vadd.f32 %v845_v42, %v1708_v14  ;;  %v972_v63 = vadd.f32 %v971_v59, %v909_v58 }
 0x12f   : > { %v973_v1 = vadd.f32 %v972_v63, %v910_v62  ;;  %v847_v60 = vadd.f32 %v1706_v5, %v846_v61  ;;  %v758_v5 = vpop.f32.mrf.mxu1 }
 0x130   : > { %v924_v50 = vmul.f32 %v758_v5, %v758_v5 }
 0x131   : > { %v848_v2 = vadd.f32 %v847_v60, %v1712_v36  ;;  %v974_v6 = vadd.f32 %v973_v1, %v911_v0  ;;  %v1327_v20 = vpop.f32.mrf.mxu1 }
 0x133   : > { %v975_v8 = vadd.f32 %v974_v6, %v912_v4  ;;  %v849_v14 = vadd.f32 %v1710_v25, %v848_v2  ;;  %v917_v25 = vmul.f32 %v1718_v3, %v1718_v3  ;;  %v768_v29 = vpop.f32.mrf.mxu1 }
 0x134   : > { %v926_v55 = vmul.f32 %v768_v29, %v768_v29 }
 0x135   : > { %v850_v9 = vadd.f32 %v849_v14, %v1716_v57  ;;  %v976_v11 = vadd.f32 %v975_v8, %v913_v7  ;;  %v918_v57 = vmul.f32 %v728_v34, %v728_v34  ;;  %v1330_v38 = vpop.f32.mrf.mxu1 }
 0x137   : > { %v977_v15 = vadd.f32 %v976_v11, %v914_v10  ;;  %v851_v36 = vadd.f32 %v1714_v47, %v850_v9  ;;  %v778_v46 = vpop.f32.mrf.mxu1 }
 0x138   : > { %v928_v62 = vmul.f32 %v778_v46, %v778_v46 }
 0x139   : > { %v852_v16 = vadd.f32 %v851_v36, %v718_v13  ;;  %v978_v19 = vadd.f32 %v977_v15, %v915_v12  ;;  %v920_v13 = vmul.f32 %v738_v17, %v738_v17  ;;  %v1333_v53 = vpop.f32.mrf.mxu1 }
 0x13b   : > { %v979_v21 = vadd.f32 %v978_v19, %v916_v18  ;;  %v853_v23 = vadd.f32 %v1718_v3, %v852_v16  ;;  %v788_v58 = vpop.f32.mrf.mxu1 }
 0x13c   : > { %v930_v2 = vmul.f32 %v788_v58, %v788_v58 }
 0x13d   : > { %v854_v26 = vadd.f32 %v853_v23, %v728_v34  ;;  %v980_v28 = vadd.f32 %v979_v21, %v917_v25  ;;  %v923_v34 = vmul.f32 %v1321_v27, %v1321_v27 }
 0x13f   : > { %v981_v31 = vadd.f32 %v980_v28, %v918_v57  ;;  %v855_v47 = vadd.f32 %v1720_v24, %v854_v26  ;;  %v925_v24 = vmul.f32 %v1324_v51, %v1324_v51 }
 0x141   : > { %v856_v33 = vadd.f32 %v855_v47, %v738_v17  ;;  %v982_v35 = vadd.f32 %v981_v31, %v919_v30 }
 0x143   : > { %v983_v40 = vadd.f32 %v982_v35, %v920_v13  ;;  %v857_v41 = vadd.f32 %v1318_v44, %v856_v33  ;;  %v927_v44 = vmul.f32 %v1327_v20, %v1327_v20 }
 0x145   : > { %v858_v43 = vadd.f32 %v857_v41, %v748_v37  ;;  %v984_v3 = vadd.f32 %v983_v40, %v921_v39  ;;  %v1336_v37 = vpop.f32.mrf.mxu1 }
 0x146   : > { %v933_v11 = vmul.f32 %v1336_v37, %v1336_v37 }
 0x147   : > { %v985_v22 = vadd.f32 %v984_v3, %v922_v45  ;;  %v859_v48 = vadd.f32 %v1321_v27, %v858_v43  ;;  %v929_v27 = vmul.f32 %v1330_v38, %v1330_v38  ;;  %v798_v6 = vpop.f32.mrf.mxu1 }
 0x148   : > { %v932_v9 = vmul.f32 %v798_v6, %v798_v6 }
 0x149   : > { %v860_v49 = vadd.f32 %v859_v48, %v758_v5  ;;  %v986_v52 = vadd.f32 %v985_v22, %v923_v34 }
 0x14b   : > { %v987_v32 = vadd.f32 %v986_v52, %v924_v50  ;;  %v861_v17 = vadd.f32 %v1324_v51, %v860_v49  ;;  %v931_v51 = vmul.f32 %v1333_v53, %v1333_v53 }
 0x14d   : > { %v862_v54 = vadd.f32 %v861_v17, %v768_v29  ;;  %v988_v56 = vadd.f32 %v987_v32, %v925_v24 }
 0x14f   : > { %v989_v59 = vadd.f32 %v988_v56, %v926_v55  ;;  %v863_v42 = vadd.f32 %v1327_v20, %v862_v54 }
 0x151   : > { %v864_v61 = vadd.f32 %v863_v42, %v778_v46  ;;  %v990_v63 = vadd.f32 %v989_v59, %v927_v44 }
 0x153   : > { %v991_v0 = vadd.f32 %v990_v63, %v928_v62  ;;  %v865_v1 = vadd.f32 %v1330_v38, %v864_v61 }
 0x155   : > { %v866_v60 = vadd.f32 %v865_v1, %v788_v58  ;;  %v992_v4 = vadd.f32 %v991_v0, %v929_v27 }
 0x157   : > { %v993_v7 = vadd.f32 %v992_v4, %v930_v2  ;;  %v867_v8 = vadd.f32 %v1333_v53, %v866_v60 }
 0x159   : > { %v868_v14 = vadd.f32 %v867_v8, %v798_v6  ;;  %v994_v10 = vadd.f32 %v993_v7, %v931_v51 }
 0x15b   : > { %v869_v5 = vadd.f32 %v1336_v37, %v868_v14  ;;  %v995_v12 = vadd.f32 %v994_v10, %v932_v9 }
 0x15d   : > { %v996_v15 = vadd.f32 %v995_v12, %v933_v11  ;;  %1005 = vst [vmem:[%s154_s7] sm:$0xff] %v869_v5 }
 0x15f   : > { %1008 = vst [vmem:[%s154_s7 + $0x8] sm:$0xff] %v996_v15 }
 0x160   : > { %1412 = shalt.err (!%p1409_p5)
}
 0x161   : > { %s1413_s26 = scalar_lea.hbm %s1775_s18, 256  ;;  %s1417_s29 = scalar_lea.hbm %s1826_s2, 512 }
 0x162   : > { %p1414_p6 = scmp.ne.s32.totalorder %s1775_s18, %s1413_s26  ;;  %p1418_p10 = scmp.lt.s32.totalorder %s1775_s18, %s1826_s2 }
 0x163   : > { %p1419_p11 = scmp.lt.s32.totalorder %s1417_s29, %s1413_s26 }
 0x164   : > { %p1415_p7 = pnand %p1414_p6, %p1535_p4 }
 0x165   : > { %p1420_p12 = por %p1419_p11, %p1418_p10 }
 0x166   : > { %p1416_p9 = pneg %p1415_p7 }
 0x168   : > { %p1421_p13 = pnand %p1420_p12, %p1416_p9 }
 0x16a   : > { %1424 = shalt.err (!%p1421_p13)
}
 0x16b   : > { %s1478_s4 = smov 128   ;;  %s1479_s5 = smov 8  }
 0x16c   : > { %1341 = dma.vmem_to_hbm [thread:$0]  (%p1535_p4), %s1777_s8, 256, %s1775_s18, %s1779_s20, %s1478_s4, %s1478_s4, %s1479_s5  }
 0x16d PF: > { %p1347_p0 = scmp.ge.s32.totalorder %s1475_s14, 2  ;;  %s1038_s6 = sand.u32 1, %s1455_s9  }
 0x16e   : > { %s1039_s7 = scalar_lea.sflag [#allocation3], %s1038_s6 }
 0x16f   : > { %p1344_p1 = pnand %p1347_p0, %p1542_p8 }
 0x171   : > { %p1345_p2 = pneg %p1344_p1 }
 0x173   : > { %1450 = dma.done.wait (%p1345_p2), %s1039_s7, 256  }
 0x174   : > { %1452 = vsyncadd (%p1345_p2), %s1039_s7, 4294967040  ;;  %s15_s14 = sadd.s32 1, %s1475_s14   ;;  %s1829_s9 = smov %s1459_s10 }
 0x175   : > { %p12_p3 = scmp.ge.s32.totalorder %s15_s14, 4   ;;  %s1830_s10 = smov %s1463_s11 }
 0x176   : > { %s1831_s11 = smov %s1548_s22  ;;  %s1832_s12 = smov %s1471_s13 }
 0x177   : > { %s1833_s13 = smov %s1835_s17  ;;  %14 = sbr.rel (!%p12_p3) target bundleno = 4 (0x4), region = 67 }
 0x17c   :  { %1044 = vsyncpa [#allocation3], 1 }
 0x17d   :  { %1046 = vsyncpa [#allocation3 + $0x1], 1 }

</bundles_post_ra>
